<compile_context>
chip_gen: v5e
topology: v5e:2x2
jax: 0.10.0
libtpu: 0.0.40
codegen_flags: <defaults>
</compile_context>

<pallas_src>
import jax
import jax.numpy as jnp
from jax.experimental import pallas as pl
from jax.experimental.pallas import tpu as pltpu

_LANE = 128
_SUBLANE = 8
_MIN_MEGACORE_ROWS = 512   # min rows per half-tile before a forced 2-way split pays off


def _round_up(n, m):
    return ((n + m - 1) // m) * m


def _cdiv(a, b):
    return -(-a // b)


def _multi_tensorcore_chip():
    """Best-effort check for chips with >1 TensorCore per chip (v4/v5p/v7x)."""
    try:
        kind = jax.devices()[0].device_kind.lower()
    except Exception:
        return False
    if "lite" in kind:          # v5e ("TPU v5 lite") has a single TC
        return False
    return any(tag in kind for tag in ("v4", "v5p", "v7"))


# ----------------------------------------------------------------------------
# Pallas kernel: fused 4-layer MLP (linear+bias+relu x3, final linear+bias)
# ----------------------------------------------------------------------------
def _mlp_kernel(x_ref,
                w1_ref, b1_ref,
                w2_ref, b2_ref,
                w3_ref, b3_ref,
                w4_ref, b4_ref,
                o_ref):
    # TODO(synk): training-mode dropout (p=0.25) omitted; inference semantics only.
    x = x_ref[...].astype(w1_ref.dtype)          # no-op in f32 path, VPU cast in bf16 path
    h = jnp.dot(x, w1_ref[...], preferred_element_type=jnp.float32) + b1_ref[...]
    h = jnp.maximum(h, 0.0)

    h = jnp.dot(h.astype(w2_ref.dtype), w2_ref[...],
                preferred_element_type=jnp.float32) + b2_ref[...]
    h = jnp.maximum(h, 0.0)

    h = jnp.dot(h.astype(w3_ref.dtype), w3_ref[...],
                preferred_element_type=jnp.float32) + b3_ref[...]
    h = jnp.maximum(h, 0.0)

    out = jnp.dot(h.astype(w4_ref.dtype), w4_ref[...],
                  preferred_element_type=jnp.float32) + b4_ref[...]
    o_ref[...] = out.astype(o_ref.dtype)


def atom_bond_decoder_section(x, params, *, tile_rows=1024, use_bf16=True):
    """Apply the decoder MLP.

    x: [..., 256].  Leading dims are flattened into a row axis.
    params: dict with w1..w4 (stored [in, out]) and b1..b4 ([out] or [1, out]).
    use_bf16: stream x/weights through the MXU in bf16 (f32 accumulation).
              Set False for bit-faithful f32 semantics.
    """
    orig_shape = x.shape
    in_dim = orig_shape[-1]
    assert in_dim == 256, "atomBondDecoderSection expects 256 input features"

    x2d = x.reshape(-1, in_dim)
    rows = x2d.shape[0]
    rows8 = _round_up(max(rows, 1), _SUBLANE)

    # ---- balanced row tiling: choose step count first, then equalize tiles.
    tile_rows = max(_round_up(tile_rows, _SUBLANE), _SUBLANE)
    num_steps = max(1, _cdiv(rows8, tile_rows))
    # Megacore-only forced split: 2 TCs can shard the row axis, but only when
    # each half still amortizes the ~0.35us/step grid overhead.
    if (num_steps == 1 and rows8 >= 2 * _MIN_MEGACORE_ROWS
            and _multi_tensorcore_chip()):
        num_steps = 2
    tile = _round_up(_cdiv(rows8, num_steps), _SUBLANE)
    padded_rows = num_steps * tile

    if padded_rows != rows:
        x2d = jnp.pad(x2d, ((0, padded_rows - rows), (0, 0)))

    # ---- parameters: real (unpadded) shapes; intermediates never touch HBM.
    atom_classes = params["w4"].shape[1]
    mm_dtype = jnp.bfloat16 if use_bf16 else jnp.float32

    def _w(name):
        return params[name].astype(mm_dtype)

    def _b(name):
        b = params[name]
        if b.ndim == 1:
            b = b[None, :]
        return b.astype(jnp.float32)

    w1, w2, w3, w4 = _w("w1"), _w("w2"), _w("w3"), _w("w4")
    b1, b2, b3, b4 = _b("b1"), _b("b2"), _b("b3"), _b("b4")

    def _whole_spec(a):
        nd = a.ndim
        return pl.BlockSpec(a.shape, lambda i, nd=nd: (0,) * nd)

    # ---- advisory cost estimate (mem-bound kernel; helps XLA scheduling).
    flops = 2 * padded_rows * (256 * 128 + 128 * 64 + 64 * 64 + 64 * atom_classes)
    param_bytes = sum(int(a.size) * a.dtype.itemsize
                      for a in (w1, b1, w2, b2, w3, b3, w4, b4))
    bytes_accessed = (int(x2d.size) * x2d.dtype.itemsize
                      + param_bytes
                      + padded_rows * atom_classes * 4)

    out2d = pl.pallas_call(
        _mlp_kernel,
        out_shape=jax.ShapeDtypeStruct((padded_rows, atom_classes), jnp.float32),
        grid_spec=pltpu.PrefetchScalarGridSpec(
            num_scalar_prefetch=0,
            grid=(num_steps,),
            in_specs=[
                pl.BlockSpec((tile, in_dim), lambda i: (i, 0)),   # x (row-tiled)
                _whole_spec(w1), _whole_spec(b1),
                _whole_spec(w2), _whole_spec(b2),
                _whole_spec(w3), _whole_spec(b3),
                _whole_spec(w4), _whole_spec(b4),
            ],
            # output block's last dim equals the full array dim -> legal and
            # avoids writing 128 padded lanes per row.
            out_specs=pl.BlockSpec((tile, atom_classes), lambda i: (i, 0)),
        ),
        compiler_params=pltpu.CompilerParams(
            dimension_semantics=("parallel",)),
        cost_estimate=pl.CostEstimate(
            flops=flops, transcendentals=0, bytes_accessed=bytes_accessed),
    )(
        x2d,
        w1, b1, w2, b2, w3, b3, w4, b4,
    )

    if padded_rows != rows:
        out2d = out2d[:rows]
    return out2d.reshape(*orig_shape[:-1], atom_classes)


# ----------------------------------------------------------------------------
# Deterministic parameter initialization (mimics torch.nn.Linear: U(-k, k),
# k = 1/sqrt(fan_in)).  Weights stored as [in, out] so the kernel does x @ W.
# ----------------------------------------------------------------------------
def init_params(key, atom_classes):
    dims = [(256, 128), (128, 64), (64, 64), (64, atom_classes)]
    params = {}
    for idx, (fan_in, fan_out) in enumerate(dims, start=1):
        key, kw, kb = jax.random.split(key, 3)
        bound = 1.0 / jnp.sqrt(jnp.float32(fan_in))
        params[f"w{idx}"] = jax.random.uniform(
            kw, (fan_in, fan_out), jnp.float32, minval=-bound, maxval=bound)
        params[f"b{idx}"] = jax.random.uniform(
            kb, (1, fan_out), jnp.float32, minval=-bound, maxval=bound)
    return params


def _reference(x, params):
    h = jax.nn.relu(x @ params["w1"] + params["b1"])
    h = jax.nn.relu(h @ params["w2"] + params["b2"])
    h = jax.nn.relu(h @ params["w3"] + params["b3"])
    return h @ params["w4"] + params["b4"]


if __name__ == "__main__":
    key = jax.random.PRNGKey(0)
    k_param, k_x, k_x2 = jax.random.split(key, 3)

    atom_classes = 16
    params = init_params(k_param, atom_classes)

    # Small example: batch=2, seq=8, hidden=256 (the layer's fixed input width).
    x = jax.random.normal(k_x, (2, 8, 256), jnp.float32)
    ref = _reference(x.reshape(-1, 256), params).reshape(2, 8, atom_classes)

    # Exact f32 path.
    out_f32 = jax.block_until_ready(
        atom_bond_decoder_section(x, params, use_bf16=False))
    assert out_f32.shape == (2, 8, atom_classes)
    assert jnp.allclose(out_f32, ref, atol=1e-3, rtol=1e-3)

    # Default bf16-streaming path (f32 accumulation) -> looser tolerance.
    out_bf16 = jax.block_until_ready(atom_bond_decoder_section(x, params))
    assert out_bf16.shape == (2, 8, atom_classes)
    assert jnp.allclose(out_bf16, ref, atol=5e-2, rtol=5e-2)

    # Exercise the multi-step / balanced-tile / row-padding path (rows=520,
    # forced small tile so grid > 1).
    x_big = jax.random.normal(k_x2, (520, 256), jnp.float32)
    out_big = jax.block_until_ready(
        atom_bond_decoder_section(x_big, params, tile_rows=256, use_bf16=False))
    ref_big = _reference(x_big, params)
    assert out_big.shape == (520, atom_classes)
    assert jnp.allclose(out_big, ref_big, atol=1e-3, rtol=1e-3)

    print("KERNEL_OK")
</pallas_src>

<mosaic_0001>
module attributes {stable_mosaic.version = 11 : i64} {
  func.func @_mlp_kernel(%arg0: i32, %arg1: memref<16x256xf32, #tpu.memory_space<vmem>>, %arg2: memref<256x128xf32, #tpu.memory_space<vmem>>, %arg3: memref<1x128xf32, #tpu.memory_space<vmem>>, %arg4: memref<128x64xf32, #tpu.memory_space<vmem>>, %arg5: memref<1x64xf32, #tpu.memory_space<vmem>>, %arg6: memref<64x64xf32, #tpu.memory_space<vmem>>, %arg7: memref<1x64xf32, #tpu.memory_space<vmem>>, %arg8: memref<64x16xf32, #tpu.memory_space<vmem>>, %arg9: memref<1x16xf32, #tpu.memory_space<vmem>>, %arg10: memref<16x16xf32, #tpu.memory_space<vmem>>) attributes {dimension_semantics = [#tpu.dimension_semantics<parallel>], iteration_bounds = array<i64: 1>, scalar_prefetch = 0 : i64, scratch_operands = 0 : i64, tpu.core_type = #tpu.core_type<tc>, window_params = [{transform_indices = @transform_0, window_bounds = array<i64: 16, 256>}, {pipeline_mode = #tpu.pipeline_mode<synchronous>, transform_indices = @transform_1, window_bounds = array<i64: 256, 128>}, {pipeline_mode = #tpu.pipeline_mode<synchronous>, transform_indices = @transform_2, window_bounds = array<i64: 1, 128>}, {pipeline_mode = #tpu.pipeline_mode<synchronous>, transform_indices = @transform_3, window_bounds = array<i64: 128, 64>}, {pipeline_mode = #tpu.pipeline_mode<synchronous>, transform_indices = @transform_4, window_bounds = array<i64: 1, 64>}, {pipeline_mode = #tpu.pipeline_mode<synchronous>, transform_indices = @transform_5, window_bounds = array<i64: 64, 64>}, {pipeline_mode = #tpu.pipeline_mode<synchronous>, transform_indices = @transform_6, window_bounds = array<i64: 1, 64>}, {pipeline_mode = #tpu.pipeline_mode<synchronous>, transform_indices = @transform_7, window_bounds = array<i64: 64, 16>}, {pipeline_mode = #tpu.pipeline_mode<synchronous>, transform_indices = @transform_8, window_bounds = array<i64: 1, 16>}, {transform_indices = @transform_9, window_bounds = array<i64: 16, 16>}]} {
    %c0 = arith.constant 0 : index
    %c0_0 = arith.constant 0 : index
    %0 = vector.load %arg1[%c0, %c0_0] : memref<16x256xf32, #tpu.memory_space<vmem>>, vector<16x256xf32>
    %c0_1 = arith.constant 0 : index
    %c0_2 = arith.constant 0 : index
    %1 = vector.load %arg2[%c0_1, %c0_2] : memref<256x128xf32, #tpu.memory_space<vmem>>, vector<256x128xf32>
    %cst = arith.constant dense<0.000000e+00> : vector<16x128xf32>
    %2 = tpu.matmul %0, %1, %cst {dimension_numbers = #tpu.dot_dimension_numbers<[1], [0], [0], [1], [0, 0, 1, 1], [], []>} : vector<16x256xf32>, vector<256x128xf32>, vector<16x128xf32> -> vector<16x128xf32>
    %c0_3 = arith.constant 0 : index
    %c0_4 = arith.constant 0 : index
    %3 = vector.load %arg3[%c0_3, %c0_4] : memref<1x128xf32, #tpu.memory_space<vmem>>, vector<1x128xf32>
    %4 = vector.broadcast %3 : vector<1x128xf32> to vector<16x128xf32>
    %5 = arith.addf %2, %4 : vector<16x128xf32>
    %cst_5 = arith.constant 0.000000e+00 : f32
    %6 = vector.broadcast %cst_5 : f32 to vector<16x128xf32>
    %7 = arith.maximumf %5, %6 : vector<16x128xf32>
    %c0_6 = arith.constant 0 : index
    %c0_7 = arith.constant 0 : index
    %8 = vector.load %arg4[%c0_6, %c0_7] : memref<128x64xf32, #tpu.memory_space<vmem>>, vector<128x64xf32>
    %cst_8 = arith.constant dense<0.000000e+00> : vector<16x64xf32>
    %9 = tpu.matmul %7, %8, %cst_8 {dimension_numbers = #tpu.dot_dimension_numbers<[1], [0], [0], [1], [0, 0, 1, 1], [], []>} : vector<16x128xf32>, vector<128x64xf32>, vector<16x64xf32> -> vector<16x64xf32>
    %c0_9 = arith.constant 0 : index
    %c0_10 = arith.constant 0 : index
    %10 = vector.load %arg5[%c0_9, %c0_10] : memref<1x64xf32, #tpu.memory_space<vmem>>, vector<1x64xf32>
    %11 = vector.broadcast %10 : vector<1x64xf32> to vector<16x64xf32>
    %12 = arith.addf %9, %11 : vector<16x64xf32>
    %cst_11 = arith.constant 0.000000e+00 : f32
    %13 = vector.broadcast %cst_11 : f32 to vector<16x64xf32>
    %14 = arith.maximumf %12, %13 : vector<16x64xf32>
    %c0_12 = arith.constant 0 : index
    %c0_13 = arith.constant 0 : index
    %15 = vector.load %arg6[%c0_12, %c0_13] : memref<64x64xf32, #tpu.memory_space<vmem>>, vector<64x64xf32>
    %cst_14 = arith.constant dense<0.000000e+00> : vector<16x64xf32>
    %16 = tpu.matmul %14, %15, %cst_14 {dimension_numbers = #tpu.dot_dimension_numbers<[1], [0], [0], [1], [0, 0, 1, 1], [], []>} : vector<16x64xf32>, vector<64x64xf32>, vector<16x64xf32> -> vector<16x64xf32>
    %c0_15 = arith.constant 0 : index
    %c0_16 = arith.constant 0 : index
    %17 = vector.load %arg7[%c0_15, %c0_16] : memref<1x64xf32, #tpu.memory_space<vmem>>, vector<1x64xf32>
    %18 = vector.broadcast %17 : vector<1x64xf32> to vector<16x64xf32>
    %19 = arith.addf %16, %18 : vector<16x64xf32>
    %cst_17 = arith.constant 0.000000e+00 : f32
    %20 = vector.broadcast %cst_17 : f32 to vector<16x64xf32>
    %21 = arith.maximumf %19, %20 : vector<16x64xf32>
    %c0_18 = arith.constant 0 : index
    %c0_19 = arith.constant 0 : index
    %22 = vector.load %arg8[%c0_18, %c0_19] : memref<64x16xf32, #tpu.memory_space<vmem>>, vector<64x16xf32>
    %cst_20 = arith.constant dense<0.000000e+00> : vector<16x16xf32>
    %23 = tpu.matmul %21, %22, %cst_20 {dimension_numbers = #tpu.dot_dimension_numbers<[1], [0], [0], [1], [0, 0, 1, 1], [], []>} : vector<16x64xf32>, vector<64x16xf32>, vector<16x16xf32> -> vector<16x16xf32>
    %c0_21 = arith.constant 0 : index
    %c0_22 = arith.constant 0 : index
    %24 = vector.load %arg9[%c0_21, %c0_22] : memref<1x16xf32, #tpu.memory_space<vmem>>, vector<1x16xf32>
    %25 = vector.broadcast %24 : vector<1x16xf32> to vector<16x16xf32>
    %26 = arith.addf %23, %25 : vector<16x16xf32>
    %c0_23 = arith.constant 0 : index
    %c0_24 = arith.constant 0 : index
    %27 = vector.load %arg10[%c0_23, %c0_24] : memref<16x16xf32, #tpu.memory_space<vmem>>, vector<16x16xf32>
    tpu.vector_store %arg10[%c0_23, %c0_24], %26 {strides = array<i32>} : memref<16x16xf32, #tpu.memory_space<vmem>>, vector<16x16xf32>,
    return
  }
  func.func @transform_0(%arg0: i32) -> (i32, i32) {
    %c0_i32 = arith.constant 0 : i32
    %c0_i32_0 = arith.constant 0 : i32
    return %arg0, %c0_i32 : i32, i32
  }
  func.func @transform_1(%arg0: i32) -> (i32, i32) {
    %c0_i32 = arith.constant 0 : i32
    %c0_i32_0 = arith.constant 0 : i32
    %c0_i32_1 = arith.constant 0 : i32
    return %c0_i32, %c0_i32_0 : i32, i32
  }
  func.func @transform_2(%arg0: i32) -> (i32, i32) {
    %c0_i32 = arith.constant 0 : i32
    %c0_i32_0 = arith.constant 0 : i32
    %c0_i32_1 = arith.constant 0 : i32
    return %c0_i32, %c0_i32_0 : i32, i32
  }
  func.func @transform_3(%arg0: i32) -> (i32, i32) {
    %c0_i32 = arith.constant 0 : i32
    %c0_i32_0 = arith.constant 0 : i32
    %c0_i32_1 = arith.constant 0 : i32
    return %c0_i32, %c0_i32_0 : i32, i32
  }
  func.func @transform_4(%arg0: i32) -> (i32, i32) {
    %c0_i32 = arith.constant 0 : i32
    %c0_i32_0 = arith.constant 0 : i32
    %c0_i32_1 = arith.constant 0 : i32
    return %c0_i32, %c0_i32_0 : i32, i32
  }
  func.func @transform_5(%arg0: i32) -> (i32, i32) {
    %c0_i32 = arith.constant 0 : i32
    %c0_i32_0 = arith.constant 0 : i32
    %c0_i32_1 = arith.constant 0 : i32
    return %c0_i32, %c0_i32_0 : i32, i32
  }
  func.func @transform_6(%arg0: i32) -> (i32, i32) {
    %c0_i32 = arith.constant 0 : i32
    %c0_i32_0 = arith.constant 0 : i32
    %c0_i32_1 = arith.constant 0 : i32
    return %c0_i32, %c0_i32_0 : i32, i32
  }
  func.func @transform_7(%arg0: i32) -> (i32, i32) {
    %c0_i32 = arith.constant 0 : i32
    %c0_i32_0 = arith.constant 0 : i32
    %c0_i32_1 = arith.constant 0 : i32
    return %c0_i32, %c0_i32_0 : i32, i32
  }
  func.func @transform_8(%arg0: i32) -> (i32, i32) {
    %c0_i32 = arith.constant 0 : i32
    %c0_i32_0 = arith.constant 0 : i32
    %c0_i32_1 = arith.constant 0 : i32
    return %c0_i32, %c0_i32_0 : i32, i32
  }
  func.func @transform_9(%arg0: i32) -> (i32, i32) {
    %c0_i32 = arith.constant 0 : i32
    %c0_i32_0 = arith.constant 0 : i32
    return %arg0, %c0_i32 : i32, i32
  }
}

</mosaic_0001>

<bundles_post_ra>
// kernel: tpu_custom_call.1
= control target key start
LH: loop header
LB: loop body
LE: loop exit
PB: predicated region body
PF: predicated region fallthrough
CT: control target
= control target key end

     0   :  { %14 = vsyncpa [#allocation3], 0  ;;  %s655_s0 = inlined_call_operand.hbm [shape: f32[16,256], index: 0, kind: input, shape index: {}]   ;;  %s656_s1 = inlined_call_operand.vmem [shape: f32[256,128], index: 1, kind: input, shape index: {}]   ;;  %s657_s2 = inlined_call_operand.vmem [shape: f32[1,128], index: 2, kind: input, shape index: {}]   ;;  %s658_s3 = inlined_call_operand.vmem [shape: f32[128,64], index: 3, kind: input, shape index: {}]   ;;  %s659_s4 = inlined_call_operand.vmem [shape: f32[1,64], index: 4, kind: input, shape index: {}]   ;;  %s660_s5 = inlined_call_operand.hbm [shape: f32[64,64], index: 5, kind: input, shape index: {}]   ;;  %s661_s6 = inlined_call_operand.vmem [shape: f32[1,64], index: 6, kind: input, shape index: {}]   ;;  %s662_s7 = inlined_call_operand.vmem [shape: f32[64,16], index: 7, kind: input, shape index: {}]   ;;  %s663_s8 = inlined_call_operand.vmem [shape: f32[1,16], index: 8, kind: input, shape index: {}]   ;;  %s664_s9 = inlined_call_operand.hbm [shape: f32[16,16], index: 9, kind: output, shape index: {}]  }
   0x1   :  { %15 = vsyncpa [#allocation6], 0 }
   0x2   :  { %16 = vsyncpa [#allocation4], 0  ;;  %s21_s11 = sshll.u32 %s655_s0, 4  ;;  %s399_s12 = smov [#allocation2]   ;;  %s22_s11 = int_to_ptr.hbm [resolvable:$true] %s21_s11 }
   0x3   :  { %s23_s13 = sshll.u32 %s399_s12, 4  ;;  %s42_s16 = sshll.u32 %s660_s5, 4  ;;  %s24_s13 = int_to_ptr.vmem [resolvable:$true] %s23_s13  ;;  %s43_s16 = int_to_ptr.hbm [resolvable:$true] %s42_s16 }
   0x4   :  { %s400_s17 = smov 256   ;;  %s401_s18 = smov 16  }
   0x5   :  { %29 = dma.hbm_to_vmem [thread:$0]  %s22_s11, 512, %s24_s13, [#allocation3], %s400_s17, %s400_s17, %s401_s18  }
   0x6   :  { %s402_s19 = smov [#allocation5]   ;;  %s403_s21 = smov 128  }
   0x7   :  { %s44_s20 = sshll.u32 %s402_s19, 4  ;;  %s404_s22 = smov 8   ;;  %s45_s20 = int_to_ptr.vmem [resolvable:$true] %s44_s20 }
   0x8   :  { %50 = dma.hbm_to_vmem [thread:$0]  %s43_s16, 1024, %s45_s20, [#allocation6], %s403_s21, %s403_s21, %s404_s22  }
   0x9   :  { %393 = dma.done.wait [#allocation3], 512  }
   0xa   :  { %394 = vsyncadd [#allocation3], 4294966784 }
   0xb   :  { %395 = dma.done.wait [#allocation6], 1024  }
   0xc   :  { %396 = vsyncadd [#allocation6], 4294966272  ;;  %v84_v0 = vld [vmem:[%s656_s1 + $0x78] sm:$0xff]  ;;  %v83_v1 = vld [vmem:[%s656_s1 + $0x70] sm:$0xff]  ;;  %vm210_vm0 = vcmask 523264   ;;  %vm283_vm1 = vcmask 130048  }
   0xd   :  { %v100_v2 = vld [vmem:[%s656_s1 + $0xf8] sm:$0xff]  ;;  %105 = vmatpush.msra.mxu0 %v84_v0  ;;  %v99_v3 = vld [vmem:[%s656_s1 + $0xf0] sm:$0xff]  ;;  %v82_v4 = vld [vmem:[%s656_s1 + $0x68] sm:$0xff]  ;;  %s292_s12 = sshll.u32 %s664_s9, 4  ;;  %s293_s12 = int_to_ptr.hbm [resolvable:$true] %s292_s12 }
   0xe   :  { %128 = vmatpush.msra.mxu1 %v100_v2  ;;  %v98_v5 = vld [vmem:[%s656_s1 + $0xe8] sm:$0xff]  ;;  %v81_v6 = vld [vmem:[%s656_s1 + $0x60] sm:$0xff]  ;;  %v80_v8 = vld [vmem:[%s656_s1 + $0x58] sm:$0xff] }
   0xf   :  { %106 = vmatpush.msra.mxu0 %v83_v1  ;;  %v97_v7 = vld [vmem:[%s656_s1 + $0xe0] sm:$0xff]  ;;  %v96_v9 = vld [vmem:[%s656_s1 + $0xd8] sm:$0xff]  ;;  %v79_v10 = vld [vmem:[%s656_s1 + $0x50] sm:$0xff] }
  0x10   :  { %129 = vmatpush.msra.mxu1 %v99_v3  ;;  %v95_v11 = vld [vmem:[%s656_s1 + $0xd0] sm:$0xff]  ;;  %v78_v12 = vld [vmem:[%s656_s1 + $0x48] sm:$0xff]  ;;  %v77_v14 = vld [vmem:[%s656_s1 + $0x40] sm:$0xff] }
  0x11   :  { %107 = vmatpush.msra.mxu0 %v82_v4  ;;  %v94_v13 = vld [vmem:[%s656_s1 + $0xc8] sm:$0xff]  ;;  %v93_v15 = vld [vmem:[%s656_s1 + $0xc0] sm:$0xff]  ;;  %v168_v16 = vld [vmem:[%s658_s3 + $0x78] sm:$0xff] }
  0x12   :  { %130 = vmatpush.msra.mxu1 %v98_v5  ;;  %v167_v17 = vld [vmem:[%s658_s3 + $0x70] sm:$0xff]  ;;  %v76_v18 = vld [vmem:[%s656_s1 + $0x38] sm:$0xff]  ;;  %173 = vmatpush.msra.mxu2 %v168_v16  ;;  %v166_v21 = vld [vmem:[%s658_s3 + $0x68] sm:$0xff] }
  0x13   :  { %108 = vmatpush.msra.mxu0 %v81_v6  ;;  %v92_v19 = vld [vmem:[%s656_s1 + $0xb8] sm:$0xff]  ;;  %v75_v20 = vld [vmem:[%s656_s1 + $0x30] sm:$0xff]  ;;  %v165_v23 = vld [vmem:[%s658_s3 + $0x60] sm:$0xff] }
  0x14   :  { %131 = vmatpush.msra.mxu1 %v97_v7  ;;  %v91_v22 = vld [vmem:[%s656_s1 + $0xb0] sm:$0xff]  ;;  %174 = vmatpush.msra.mxu2 %v167_v17  ;;  %v74_v24 = vld [vmem:[%s656_s1 + $0x28] sm:$0xff]  ;;  %v164_v26 = vld [vmem:[%s658_s3 + $0x58] sm:$0xff] }
  0x15   :  { %109 = vmatpush.msra.mxu0 %v80_v8  ;;  %v90_v25 = vld [vmem:[%s656_s1 + $0xa8] sm:$0xff]  ;;  %v73_v27 = vld [vmem:[%s656_s1 + $0x20] sm:$0xff]  ;;  %v163_v29 = vld [vmem:[%s658_s3 + $0x50] sm:$0xff] }
  0x16   :  { %132 = vmatpush.msra.mxu1 %v96_v9  ;;  %175 = vmatpush.msra.mxu2 %v166_v21  ;;  %v89_v28 = vld [vmem:[%s656_s1 + $0xa0] sm:$0xff]  ;;  %v72_v30 = vld [vmem:[%s656_s1 + $0x18] sm:$0xff]  ;;  %v162_v32 = vld [vmem:[%s658_s3 + $0x48] sm:$0xff] }
  0x17   :  { %110 = vmatpush.msra.mxu0 %v79_v10  ;;  %v88_v31 = vld [vmem:[%s656_s1 + $0x98] sm:$0xff]  ;;  %v71_v33 = vld [vmem:[%s656_s1 + $0x10] sm:$0xff]  ;;  %v161_v35 = vld [vmem:[%s658_s3 + $0x40] sm:$0xff] }
  0x18   :  { %133 = vmatpush.msra.mxu1 %v95_v11  ;;  %176 = vmatpush.msra.mxu2 %v165_v23  ;;  %v87_v34 = vld [vmem:[%s656_s1 + $0x90] sm:$0xff]  ;;  %v70_v36 = vld [vmem:[%s656_s1 + $0x8] sm:$0xff]  ;;  %v160_v38 = vld [vmem:[%s658_s3 + $0x38] sm:$0xff] }
  0x19   :  { %111 = vmatpush.msra.mxu0 %v78_v12  ;;  %v86_v37 = vld [vmem:[%s656_s1 + $0x88] sm:$0xff]  ;;  %v69_v39 = vld [vmem:[%s656_s1] sm:$0xff]  ;;  %v159_v43 = vld [vmem:[%s658_s3 + $0x30] sm:$0xff] }
  0x1a   :  { %134 = vmatpush.msra.mxu1 %v94_v13  ;;  %177 = vmatpush.msra.mxu2 %v164_v26  ;;  %v85_v40 = vld [vmem:[%s656_s1 + $0x80] sm:$0xff]  ;;  %v66_v42 = vld [vmem:[#allocation2 + $0x8] sm:$0xff]  ;;  %v67_v46 = vld [vmem:[#allocation2 + $0x10] sm:$0xff] }
  0x1b   :  { %112 = vmatpush.msra.mxu0 %v77_v14  ;;  %v65_v41 = vld [vmem:[#allocation2] sm:$0xff]  ;;  %v158_v44 = vld [vmem:[%s658_s3 + $0x28] sm:$0xff]  ;;  %v68_v47 = vld [vmem:[#allocation2 + $0x18] sm:$0xff] }
  0x1c   :  { %135 = vmatpush.msra.mxu1 %v93_v15  ;;  %178 = vmatpush.msra.mxu2 %v163_v29  ;;  %v157_v45 = vld [vmem:[%s658_s3 + $0x20] sm:$0xff]  ;;  %v156_v48 = vld [vmem:[%s658_s3 + $0x18] sm:$0xff]  ;;  %v155_v49 = vld [vmem:[%s658_s3 + $0x10] sm:$0xff] }
  0x1d   :  { %113 = vmatpush.msra.mxu0 %v76_v18  ;;  %v154_v50 = vld [vmem:[%s658_s3 + $0x8] sm:$0xff]  ;;  %v153_v51 = vld [vmem:[%s658_s3] sm:$0xff]  ;;  %v205_v52 = vld [vmem:[#allocation5 + $0x38] sm:$0xff] }
  0x1e   :  { %136 = vmatpush.msra.mxu1 %v92_v19  ;;  %179 = vmatpush.msra.mxu2 %v162_v32  ;;  %v204_v53 = vld [vmem:[#allocation5 + $0x30] sm:$0xff]  ;;  %v203_v54 = vld [vmem:[#allocation5 + $0x28] sm:$0xff]  ;;  %v202_v55 = vld [vmem:[#allocation5 + $0x20] sm:$0xff] }
  0x1f   :  { %114 = vmatpush.msra.mxu0 %v75_v20  ;;  %225 = vmatpush.msra.mxu3 %v205_v52  ;;  %v201_v56 = vld [vmem:[#allocation5 + $0x18] sm:$0xff]  ;;  %v317_v57 = vld [vmem:[%s657_s2] ss:$0 sm:$0xff]  ;;  %v200_v4 = vld [vmem:[#allocation5 + $0x10] sm:$0xff] }
  0x20   :  { %137 = vmatpush.msra.mxu1 %v91_v22  ;;  %180 = vmatpush.msra.mxu2 %v161_v35  ;;  %v199_v5 = vld [vmem:[#allocation5 + $0x8] sm:$0xff]  ;;  %v198_v6 = vld [vmem:[#allocation5] sm:$0xff]  ;;  %v249_v7 = vld [vmem:[%s662_s7 + $0x38] sm:$0xff] }
  0x21   :  { %115 = vmatpush.msra.mxu0 %v74_v24  ;;  %226 = vmatpush.msra.mxu3 %v204_v53  ;;  %v248_v8 = vld [vmem:[%s662_s7 + $0x30] sm:$0xff]  ;;  %v247_v9 = vld [vmem:[%s662_s7 + $0x28] sm:$0xff]  ;;  %v246_v10 = vld [vmem:[%s662_s7 + $0x20] sm:$0xff] }
  0x22   :  { %138 = vmatpush.msra.mxu1 %v90_v25  ;;  %181 = vmatpush.msra.mxu2 %v160_v38  ;;  %v245_v11 = vld [vmem:[%s662_s7 + $0x18] sm:$0xff]  ;;  %v244_v12 = vld [vmem:[%s662_s7 + $0x10] sm:$0xff]  ;;  %v318_v13 = vld [vmem:[%s659_s4] ss:$0 sm:$0xff] }
  0x23   :  { %116 = vmatpush.msra.mxu0 %v73_v27  ;;  %227 = vmatpush.msra.mxu3 %v203_v54  ;;  %v243_v20 = vld [vmem:[%s662_s7 + $0x8] sm:$0xff]  ;;  %v242_v21 = vld [vmem:[%s662_s7] sm:$0xff]  ;;  %s405_s7 = smov [#allocation7]  }
  0x24   :  { %139 = vmatpush.msra.mxu1 %v89_v28  ;;  %182 = vmatpush.msra.mxu2 %v159_v43  ;;  %v319_v22 = vld [vmem:[%s661_s6] ss:$0 sm:$0xff]  ;;  %s290_s6 = sshll.u32 %s405_s7, 4  ;;  %s291_s6 = int_to_ptr.vmem [resolvable:$true] %s290_s6 }
  0x25   :  { %117 = vmatpush.msra.mxu0 %v72_v30  ;;  %228 = vmatpush.msra.mxu3 %v202_v55  ;;  %v320_v29 = vld [vmem:[%s663_s8] ss:$0 sm:$0xff] }
  0x26   :  { %140 = vmatpush.msra.mxu1 %v88_v31  ;;  %183 = vmatpush.msra.mxu2 %v158_v44 }
  0x27   :  { %118 = vmatpush.msra.mxu0 %v71_v33  ;;  %229 = vmatpush.msra.mxu3 %v201_v56 }
  0x28   :  { %141 = vmatpush.msra.mxu1 %v87_v34  ;;  %184 = vmatpush.msra.mxu2 %v157_v45 }
  0x29   :  { %119 = vmatpush.msra.mxu0 %v70_v36  ;;  %230 = vmatpush.msra.mxu3 %v200_v4 }
  0x2a   :  { %142 = vmatpush.msra.mxu1 %v86_v37  ;;  %185 = vmatpush.msra.mxu2 %v156_v48 }
  0x2b   :  { %120 = vmatpush.msra.mxu0 %v69_v39  ;;  %231 = vmatpush.msra.mxu3 %v199_v5 }
  0x2c   :  { %143 = vmatpush.msra.mxu1 %v85_v40  ;;  %121 = vmatmul.f32.vlgmr.msra.gmra.mxu0 %v65_v41 }
  0x2d   :  { %144 = vmatmul.f32.vlgmr.msra.gmra.mxu1 %v66_v42  ;;  %186 = vmatpush.msra.mxu2 %v155_v49 }
  0x2e   :  { %232 = vmatpush.msra.mxu3 %v198_v6 }
  0x2f   :  { %187 = vmatpush.msra.mxu2 %v154_v50 }
  0x30   :  { %268 = vmatpush.msrb.mxu3 %v249_v7 }
  0x31   :  { %188 = vmatpush.msra.mxu2 %v153_v51 }
  0x32   :  { %269 = vmatpush.msrb.mxu3 %v248_v8 }
  0x34   :  { %124 = vmatmul.f32.gmra.mxu0 %v67_v46  ;;  %270 = vmatpush.msrb.mxu3 %v247_v9 }
  0x35   :  { %147 = vmatmul.f32.gmra.mxu1 %v68_v47 }
  0x36   :  { %271 = vmatpush.msrb.mxu3 %v246_v10 }
  0x38   :  { %272 = vmatpush.msrb.mxu3 %v245_v11 }
  0x3a   :  { %273 = vmatpush.msrb.mxu3 %v244_v12 }
  0x3c   :  { %274 = vmatpush.msrb.mxu3 %v243_v20 }
  0x3e   :  { %275 = vmatpush.msrb.mxu3 %v242_v21 }
  0xa9   :  { %v122_v58 = vpop.f32.mrf.mxu0 }
  0xaa   :  { %v145_v59 = vpop.f32.mrf.mxu1  ;;  %v123_v60 = vadd.f32 %v317_v57, %v122_v58 }
  0xac   :  { %v146_v61 = vadd.f32 %v145_v59, %v123_v60 }
  0xae   :  { %v151_v62 = vmax.f32 %v146_v61, 0.0 }
  0xb0   :  { %189 = vmatmul.f32.vlgmr.msra.gmra.mxu2 %v151_v62 }
  0xb1   :  { %v125_v63 = vpop.f32.mrf.mxu0 }
  0xb2   :  { %v148_v0 = vpop.f32.mrf.mxu1  ;;  %v126_v1 = vadd.f32 %v317_v57, %v125_v63 }
  0xb4   :  { %v149_v2 = vadd.f32 %v148_v0, %v126_v1 }
  0xb6   :  { %v152_v3 = vmax.f32 %v149_v2, 0.0 }
  0xb8   :  { %192 = vmatmul.f32.gmra.mxu2 %v152_v3 }
 0x133   :  { %v190_v14 = vpop.f32.mrf.mxu2 }
 0x134   :  { %v191_v15 = vadd.f32 %v318_v13, %v190_v14 }
 0x136   :  { %v196_v16 = vmax.f32 %v191_v15, 0.0 }
 0x138   :  { %306 = vmatmul.msk.f32.vlgmr.msra.gmra.mxu3 %vm210_vm0, %v196_v16 }
 0x13b   :  { %v193_v17 = vpop.f32.mrf.mxu2 }
 0x13c   :  { %v194_v18 = vadd.f32 %v318_v13, %v193_v17 }
 0x13e   :  { %v197_v19 = vmax.f32 %v194_v18, 0.0 }
 0x140   :  { %307 = vmatmul.msk.f32.gmra.mxu3 %vm210_vm0, %v197_v19 }
 0x1bb   :  { %v234_v23 = vpop.f32.mrf.mxu3 }
 0x1bc   :  { %v235_v24 = vadd.f32 %v319_v22, %v234_v23 }
 0x1be   :  { %v240_v25 = vmax.f32 %v235_v24, 0.0 }
 0x1c0   :  { %308 = vmatmul.msk.f32.vlgmr.msrb.gmra.mxu3 %vm210_vm0, %v240_v25 }
 0x1c3   :  { %v237_v26 = vpop.f32.mrf.mxu3 }
 0x1c4   :  { %v238_v27 = vadd.f32 %v319_v22, %v237_v26 }
 0x1c6   :  { %v241_v28 = vmax.f32 %v238_v27, 0.0 }
 0x1c8   :  { %309 = vmatmul.msk.f32.gmra.mxu3 %vm210_vm0, %v241_v28 }
 0x243   :  { %v277_v30 = vpop.f32.mrf.mxu3 }
 0x244   :  { %v278_v31 = vadd.f32 %v320_v29, %v277_v30 }
 0x246   :  { %284 = vst.msk [vmem:[#allocation7] sm:$0xff] %vm283_vm1, %v278_v31 }
 0x24b   :  { %v280_v32 = vpop.f32.mrf.mxu3 }
 0x24c   :  { %v281_v33 = vadd.f32 %v320_v29, %v280_v32 }
 0x24e   :  { %285 = vst.msk [vmem:[#allocation7 + $0x8] sm:$0xff] %vm283_vm1, %v281_v33 }
 0x24f   :  { %298 = dma.vmem_to_hbm [thread:$0]  %s291_s6, 256, %s293_s12, [#allocation4], %s403_s21, %s403_s21, %s404_s22  }
 0x250   :  { %397 = dma.done.wait [#allocation4], 256  }
 0x251   :  { %398 = vsyncadd [#allocation4], 4294967040 }
 0x252   :  { %303 = vsyncpa [#allocation3], 1 }
 0x253   :  { %304 = vsyncpa [#allocation6], 1 }
 0x254   :  { %305 = vsyncpa [#allocation4], 1 }

</bundles_post_ra>
